<compile_context>
chip_gen: v7x
topology: tpu7x:2x2x1
jax: 0.10.0
libtpu: 0.0.40
codegen_flags: <defaults>
</compile_context>

<pallas_src>
import jax
import jax.numpy as jnp
from jax.experimental import pallas as pl
from jax.experimental.pallas import tpu as pltpu

N = 3
IN_DIM = 2 * N + 2      # 8
HID_DIM = N + 1         # 4
HID_PAD = 8             # hidden dim zero-padded to one f32 sublane tile
OUT_DIM = 1


def simplenn_kernel(w1_ref, b1_ref, w2t_ref, b2_ref, x_ref, o_ref):
    """One lane-dense batch tile of the whole network.

    w1_ref:  (HID_PAD, IN_DIM)  VMEM  hidden weights, rows >= HID_DIM are zero
    b1_ref:  (HID_PAD, 1)       VMEM  hidden bias (zero-padded)
    w2t_ref: (HID_PAD, 1)       VMEM  output weights, transposed + zero-padded
    b2_ref:  (1, 1)             VMEM  output bias
    x_ref:   (IN_DIM, B_BLK)    VMEM  input tile, batch on the lane axis
    o_ref:   (1, B_BLK)         VMEM  output tile, batch on the lane axis
    """
    ax = jnp.abs(x_ref[...])                                   # (8, B_BLK)   VPU

    # Hidden layer on the MXU: (8, 8) @ (8, B_BLK) -> (8, B_BLK).
    h = jnp.dot(w1_ref[...], ax, preferred_element_type=jnp.float32)
    h = jnp.maximum(h + b1_ref[...], 0.0)                      # bias + relu  VPU

    # Output layer: sublane-broadcast weights + XLU sublane reduce -> (1, B_BLK).
    z = jnp.sum(h * w2t_ref[...], axis=0, keepdims=True)
    o_ref[...] = jnp.maximum(z + b2_ref[...], 0.0)             # bias + relu  VPU


def _round_up(v, m):
    return ((v + m - 1) // m) * m


def simplenn_forward(x, w1, b1, w2, b2, *, block_b=65536, x_is_feature_major=False):
    """SimpleNN forward.

    x : (B, 8) float (PyTorch layout), or (8, B) if x_is_feature_major=True.
    w1: (4, 8), b1: (4,), w2: (1, 4), b2: (1,)   (PyTorch nn.Linear layout)
    Returns (B, 1) float32, matching SimpleNN.forward.
    """
    if x_is_feature_major:
        x_t = x.astype(jnp.float32)                 # already (IN_DIM, B)
    else:
        # TODO(synk): if the producer can emit feature-major (8, B) data this
        # transpose (one extra HBM pass) disappears entirely.
        x_t = x.astype(jnp.float32).T               # (IN_DIM, B)
    B = x_t.shape[1]

    # Lane-aligned batch tiling (no jnp.pad: Pallas masks the partial tail tile).
    b_aligned = max(128, _round_up(B, 128))
    block_b = max(128, _round_up(int(block_b), 128))
    block_b = min(block_b, b_aligned)
    # Prefer >= 2 grid steps when there is enough work so the "parallel" batch
    # axis can shard across both TensorCores on v7x megacore parts.
    if b_aligned > 128 and pl.cdiv(B, block_b) < 2:
        block_b = _round_up(pl.cdiv(b_aligned, 2), 128)
    num_blocks = pl.cdiv(B, block_b)

    # Zero-pad the tiny parameters to one f32 sublane tile (8 rows); the extra
    # rows contribute relu(0 + 0) = 0 through zero output weights -> exact.
    w1p = jnp.zeros((HID_PAD, IN_DIM), jnp.float32).at[:HID_DIM, :].set(
        w1.astype(jnp.float32))
    b1p = jnp.zeros((HID_PAD, 1), jnp.float32).at[:HID_DIM, 0].set(
        b1.astype(jnp.float32))
    w2tp = jnp.zeros((HID_PAD, 1), jnp.float32).at[:HID_DIM, 0].set(
        w2.astype(jnp.float32)[0, :])
    b2r = b2.astype(jnp.float32).reshape(1, 1)

    # VMEM budget: double-buffered x (2*8*4 B) + out (2*1*4 B) per element,
    # plus in-kernel temporaries (abs(x), dot result, h, ...). Cap at 48 MiB
    # so it is also safe on v7x's 64 MiB physical VMEM.
    per_elem_bytes = 4 * (2 * IN_DIM + 2 * OUT_DIM + 3 * HID_PAD + 2)
    vmem_limit = int(min(max(per_elem_bytes * block_b + (4 << 20), 16 << 20),
                         48 << 20))

    vmem = pltpu.MemorySpace.VMEM
    out = pl.pallas_call(
        simplenn_kernel,
        out_shape=jax.ShapeDtypeStruct((OUT_DIM, B), jnp.float32),
        grid=(num_blocks,),
        in_specs=[
            pl.BlockSpec(memory_space=vmem),                         # w1 (resident)
            pl.BlockSpec(memory_space=vmem),                         # b1
            pl.BlockSpec(memory_space=vmem),                         # w2^T
            pl.BlockSpec(memory_space=vmem),                         # b2
            pl.BlockSpec((IN_DIM, block_b), lambda i: (0, i)),       # x tile
        ],
        out_specs=pl.BlockSpec((OUT_DIM, block_b), lambda i: (0, i)),
        compiler_params=pltpu.CompilerParams(
            dimension_semantics=("parallel",),
            vmem_limit_bytes=vmem_limit,
        ),
    )(w1p, b1p, w2tp, b2r, x_t)

    return out[0, :].reshape(B, OUT_DIM)


def init_params(key):
    """Deterministic PyTorch-style Linear init: U(-1/sqrt(fan_in), 1/sqrt(fan_in))."""
    k1, k2, k3, k4 = jax.random.split(key, 4)
    bound1 = 1.0 / jnp.sqrt(IN_DIM)
    bound2 = 1.0 / jnp.sqrt(HID_DIM)
    w1 = jax.random.uniform(k1, (HID_DIM, IN_DIM), jnp.float32, -bound1, bound1)
    b1 = jax.random.uniform(k2, (HID_DIM,), jnp.float32, -bound1, bound1)
    w2 = jax.random.uniform(k3, (OUT_DIM, HID_DIM), jnp.float32, -bound2, bound2)
    b2 = jax.random.uniform(k4, (OUT_DIM,), jnp.float32, -bound2, bound2)
    return w1, b1, w2, b2


def reference_forward(x, w1, b1, w2, b2):
    h = jnp.maximum(jnp.abs(x) @ w1.T + b1, 0.0)
    z = jnp.maximum(jnp.abs(h) @ w2.T + b2, 0.0)
    return z


if __name__ == "__main__":
    key = jax.random.PRNGKey(0)
    k_params, k_x = jax.random.split(key)

    w1, b1, w2, b2 = init_params(k_params)

    # Small demo: B = 300 exercises >= 2 grid steps plus a masked partial tail
    # tile (no wrapper-side padding).
    B = 300
    x = jax.random.normal(k_x, (B, IN_DIM), jnp.float32)

    out = simplenn_forward(x, w1, b1, w2, b2)
    out = jax.block_until_ready(out)

    ref = reference_forward(x, w1, b1, w2, b2)
    assert out.shape == (B, OUT_DIM)
    assert jnp.allclose(out, ref, atol=1e-5, rtol=1e-5)

    print("KERNEL_OK")
</pallas_src>

<mosaic_0001>
module attributes {stable_mosaic.version = 11 : i64} {
  func.func @simplenn_kernel(%arg0: i32, %arg1: memref<8x8xf32, #tpu.memory_space<vmem>>, %arg2: memref<8x1xf32, #tpu.memory_space<vmem>>, %arg3: memref<8x1xf32, #tpu.memory_space<vmem>>, %arg4: memref<1x1xf32, #tpu.memory_space<vmem>>, %arg5: memref<8x256xf32, #tpu.memory_space<vmem>>, %arg6: memref<1x256xf32, #tpu.memory_space<vmem>>) attributes {dimension_semantics = [#tpu.dimension_semantics<parallel>], iteration_bounds = array<i64: 2>, scalar_prefetch = 0 : i64, scratch_operands = 0 : i64, tpu.core_type = #tpu.core_type<tc>, window_params = [{pipeline_mode = #tpu.pipeline_mode<synchronous>, transform_indices = @transform_0, window_bounds = array<i64: 8, 8>}, {pipeline_mode = #tpu.pipeline_mode<synchronous>, transform_indices = @transform_1, window_bounds = array<i64: 8, 1>}, {pipeline_mode = #tpu.pipeline_mode<synchronous>, transform_indices = @transform_2, window_bounds = array<i64: 8, 1>}, {pipeline_mode = #tpu.pipeline_mode<synchronous>, transform_indices = @transform_3, window_bounds = array<i64: 1, 1>}, {transform_indices = @transform_4, window_bounds = array<i64: 8, 256>}, {transform_indices = @transform_5, window_bounds = array<i64: 1, 256>}]} {
    %c0 = arith.constant 0 : index
    %c0_0 = arith.constant 0 : index
    %0 = vector.load %arg5[%c0, %c0_0] : memref<8x256xf32, #tpu.memory_space<vmem>>, vector<8x256xf32>
    %1 = math.absf %0 : vector<8x256xf32>
    %c0_1 = arith.constant 0 : index
    %c0_2 = arith.constant 0 : index
    %2 = vector.load %arg1[%c0_1, %c0_2] : memref<8x8xf32, #tpu.memory_space<vmem>>, vector<8x8xf32>
    %cst = arith.constant dense<0.000000e+00> : vector<8x256xf32>
    %3 = tpu.matmul %2, %1, %cst {dimension_numbers = #tpu.dot_dimension_numbers<[1], [0], [0], [1], [0, 0, 1, 1], [], []>} : vector<8x8xf32>, vector<8x256xf32>, vector<8x256xf32> -> vector<8x256xf32>
    %c0_3 = arith.constant 0 : index
    %c0_4 = arith.constant 0 : index
    %4 = vector.load %arg2[%c0_3, %c0_4] : memref<8x1xf32, #tpu.memory_space<vmem>>, vector<8x1xf32>
    %5 = vector.broadcast %4 : vector<8x1xf32> to vector<8x256xf32>
    %6 = arith.addf %3, %5 : vector<8x256xf32>
    %cst_5 = arith.constant 0.000000e+00 : f32
    %7 = vector.broadcast %cst_5 : f32 to vector<8x256xf32>
    %8 = arith.maximumf %6, %7 : vector<8x256xf32>
    %c0_6 = arith.constant 0 : index
    %c0_7 = arith.constant 0 : index
    %9 = vector.load %arg3[%c0_6, %c0_7] : memref<8x1xf32, #tpu.memory_space<vmem>>, vector<8x1xf32>
    %10 = vector.broadcast %9 : vector<8x1xf32> to vector<8x256xf32>
    %11 = arith.mulf %8, %10 : vector<8x256xf32>
    %cst_8 = arith.constant dense<0.000000e+00> : vector<256xf32>
    %12 = vector.multi_reduction <add>, %11, %cst_8 [0] : vector<8x256xf32> to vector<256xf32>
    %13 = vector.shape_cast %12 : vector<256xf32> to vector<1x256xf32>
    %c0_9 = arith.constant 0 : index
    %c0_10 = arith.constant 0 : index
    %14 = vector.load %arg4[%c0_9, %c0_10] : memref<1x1xf32, #tpu.memory_space<vmem>>, vector<1x1xf32>
    %15 = vector.broadcast %14 : vector<1x1xf32> to vector<1x256xf32>
    %16 = arith.addf %13, %15 : vector<1x256xf32>
    %cst_11 = arith.constant 0.000000e+00 : f32
    %17 = vector.broadcast %cst_11 : f32 to vector<1x256xf32>
    %18 = arith.maximumf %16, %17 : vector<1x256xf32>
    %c0_12 = arith.constant 0 : index
    %c0_13 = arith.constant 0 : index
    %19 = vector.load %arg6[%c0_12, %c0_13] : memref<1x256xf32, #tpu.memory_space<vmem>>, vector<1x256xf32>
    tpu.vector_store %arg6[%c0_12, %c0_13], %18 {strides = array<i32>} : memref<1x256xf32, #tpu.memory_space<vmem>>, vector<1x256xf32>,
    return
  }
  func.func @transform_0(%arg0: i32) -> (i32, i32) {
    %c0_i32 = arith.constant 0 : i32
    %c0_i32_0 = arith.constant 0 : i32
    %c0_i32_1 = arith.constant 0 : i32
    return %c0_i32, %c0_i32_0 : i32, i32
  }
  func.func @transform_1(%arg0: i32) -> (i32, i32) {
    %c0_i32 = arith.constant 0 : i32
    %c0_i32_0 = arith.constant 0 : i32
    %c0_i32_1 = arith.constant 0 : i32
    return %c0_i32, %c0_i32_0 : i32, i32
  }
  func.func @transform_2(%arg0: i32) -> (i32, i32) {
    %c0_i32 = arith.constant 0 : i32
    %c0_i32_0 = arith.constant 0 : i32
    %c0_i32_1 = arith.constant 0 : i32
    return %c0_i32, %c0_i32_0 : i32, i32
  }
  func.func @transform_3(%arg0: i32) -> (i32, i32) {
    %c0_i32 = arith.constant 0 : i32
    %c0_i32_0 = arith.constant 0 : i32
    %c0_i32_1 = arith.constant 0 : i32
    return %c0_i32, %c0_i32_0 : i32, i32
  }
  func.func @transform_4(%arg0: i32) -> (i32, i32) {
    %c0_i32 = arith.constant 0 : i32
    %c0_i32_0 = arith.constant 0 : i32
    return %c0_i32, %arg0 : i32, i32
  }
  func.func @transform_5(%arg0: i32) -> (i32, i32) {
    %c0_i32 = arith.constant 0 : i32
    %c0_i32_0 = arith.constant 0 : i32
    return %c0_i32, %arg0 : i32, i32
  }
}

</mosaic_0001>

<bundles_post_ra>
// kernel: tpu_custom_call.1
= control target key start
LH: loop header
LB: loop body
LE: loop exit
PB: predicated region body
PF: predicated region fallthrough
CT: control target
= control target key end

     0   :  { %s760_s0 = inlined_call_operand.vmem [shape: f32[8,8], index: 0, kind: input, shape index: {}]   ;;  %s761_s1 = inlined_call_operand.vmem [shape: f32[8,1], index: 1, kind: input, shape index: {}]   ;;  %s762_s2 = inlined_call_operand.vmem [shape: f32[8,1], index: 2, kind: input, shape index: {}]   ;;  %s763_s3 = inlined_call_operand.<no memory space> [shape: f32[1,1], index: 3, kind: input, shape index: {}]   ;;  %s764_s4 = inlined_call_operand.vmem [shape: f32[8,300], index: 4, kind: input, shape index: {}]   ;;  %s765_s5 = inlined_call_operand.hbm [shape: f32[1,300], index: 5, kind: output, shape index: {}]  }
   0x1   :  { %v10_v0 = vstv %s763_s3 }
   0x2   :  { %11 = vst [vmem:[#allocation2] sm:$0x1] %v10_v0 }
   0x3   :  { %12 = vsyncpa [#allocation4], 0 }
   0x4   :  { %14 = vsyncpa [#allocation4 + $0x1], 0  ;;  %s636_s20 = smov 0   ;;  %s638_s21 = smov 0  }
   0x5   :  { %s640_s22 = smov 0   ;;  %s642_s23 = smov 0  }
   0x6 LB: > { %s657_s3 = sadd.s32 4294967295, %s597_s23   ;;  %s476_s24 = sadd.s32 4294967294, %s597_s23   ;;  %s597_s23 = sphi %s642_s23, %s771_s23   ;;  %s593_s22 = sphi %s640_s22, %s770_s22   ;;  %s589_s21 = sphi %s638_s21, %s769_s21   ;;  %s585_s20 = sphi %s636_s20, %s768_s20  }
   0x7   : > { %s661_s25 = sadd.s32 1, %s597_s23   ;;  %s137_s26 = sadd.s32 1, %s593_s22 }
   0x8   : > { %s134_s27 = ssub.s32 %s597_s23, %s661_s25  ;;  %p147_p0 = scmp.ne.s32.totalorder %s593_s22, %s589_s21 }
   0x9   : > { %p135_p1 = scmp.eq.s32.totalorder %s134_s27, 0  ;;  %p148_p2 = scmp.eq.s32.totalorder %s657_s3, 1 }
   0xa   : > { %p153_p3 = scmp.ne.s32.totalorder %s589_s21, %s585_s20  ;;  %p154_p4 = scmp.eq.s32.totalorder %s476_s24, 1 }
   0xb   : > { %s672_s28 = scalar_select %p135_p1, %s593_s22, %s137_s26  }
   0xc   : > { %p674_p5 = por %p148_p2, %p147_p0  ;;  %p678_p6 = por %p154_p4, %p153_p3 }
   0xd   : > { %p479_p7 = scmp.ge.s32.totalorder %s597_s23, 1  ;;  %p201_p8 = scmp.lt.s32.totalorder %s597_s23, 3 }
   0xf   : > { %p202_p9 = pnand %p479_p7, %p201_p8 }
  0x10   : > { %s685_s6 = sshll.u32 (!%p202_p9), %s657_s3, 1  ;;  %v257_v1 = vld [vmem:[%s761_s1] sm:$0xff] (!%p202_p9)  ;;  %v599_v2 = vmov (!%p202_p9), 0.0   ;;  %v600_v3 = vmov (!%p202_p9), 0   ;;  %vm263_vm0 = vcmask (!%p202_p9), 64512   ;;  %s230_s18 = sand.u32 (!%p202_p9), 1, %s589_s21   ;;  %v366_v17 = vlaneseq (!%p202_p9) }
  0x11   : > { %205 = sbr.rel (%p202_p9) target bundleno = 302 (0x12e), region = 40  ;;  %p238_p10 = scmp.lt.s32.totalorder (!%p202_p9), %s685_s6, 2  ;;  %331 = vmatprep.mubr.f32.mxu0 (!%p202_p9), %v599_v2  ;;  %533 = vset.pattern.permute.xlu0 (!%p202_p9), %v600_v3  ;;  %v360_v4 = vld [vmem:[#allocation2] sm:$0x1] (!%p202_p9)  ;;  %v601_v32 = vmov (!%p202_p9), 1966171168  }
  0x12   : > { %260 = vperm.xlu0 (!%p202_p9), %533, %v257_v1   ;;  %534 = vset.pattern.permute.xlu1 (!%p202_p9), %v600_v3  ;;  %v340_v5 = vld [vmem:[%s762_s2] sm:$0xff] (!%p202_p9)  ;;  %v367_v23 = vshrl.u32 (!%p202_p9), %v366_v17, 7  ;;  %v378_v33 = vunpack.c.l.s4 (!%p202_p9), %v601_v32  ;;  %s480_s19 = sshll.u32 (!%p202_p9), %s230_s18, 1  ;;  %vm394_vm1 = vcmp.lt.s32.totalorder (!%p202_p9), %v366_v17, 256  ;;  %s706_s26 = scalar_lea.sflag (!%p202_p9), [#allocation4], %s230_s18 }
  0x13   : > { %363 = vperm.xlu1 (!%p202_p9), %534, %v360_v4   ;;  %v256_v10 = vld [vmem:[%s760_s0] sm:$0xff] (!%p202_p9)  ;;  %s232_s24 = scalar_lea.vmem (!%p202_p9), [#allocation3], %s480_s19 }
  0x14   : > { %v368_v28 = vsub.s32 (!%p202_p9), 0, %v367_v23  ;;  %v379_v39 = vunpack.c.0.s8 (!%p202_p9), %v378_v33 }
  0x16   : > { %343 = vperm.xlu0 (!%p202_p9), %533, %v340_v5   ;;  %v382_v44 = vsub.s32 (!%p202_p9), %v379_v39, %v367_v23 }
  0x18   : > { %s239_s9 = scalar_select %p238_p10, %s685_s6, 2 }
  0x19   : > { %s406_s27 = ssub.s32 (%p674_p5), 3, %s685_s6 }
  0x1a   : > { %s482_s12 = sshll.u32 %s239_s9, 3  ;;  %p407_p11 = scmp.lt.s32.totalorder (%p674_p5), %s406_s27, 2 }
  0x1b   : > { %s241_s15 = scalar_lea.vmem %s764_s4, %s482_s12 }
  0x1c   : > { %v253_v6 = vld [vmem:[%s241_s15 + $0x8] sm:$0xff]  ;;  %v252_v7 = vld [vmem:[%s241_s15] sm:$0xff] }
  0x1d   : > { %v255_v8 = vand.u32 2147483647, %v253_v6  ;;  %v254_v9 = vand.u32 2147483647, %v252_v7 }
  0x1f   : > { %267 = vmatprep.subr.mxu0 %v255_v8 }
  0x20   : > { %268 = vmatpush1.msra.mxu0 %v254_v9 }
  0x21   : > { %483 = vmatmul.mubr.msk.f32.vlgmr.msra.gmra.mrb[0].mxu0 %vm263_vm0, %v256_v10 }
  0x91   : > { %v261_v11 = vpop.permute.xlu0 %260 }
  0x92   : > { %v364_v30 = vpop.permute.xlu1 %363 }
  0x93   : > { %v369_v36 = vrot.slane %v364_v30, %v368_v28 }
  0x95   : > { %v344_v18 = vpop.permute.xlu0 %343 }
  0xf4   : > { %v333_v12 = vpop.f32.mrb[0].mxu0 }
  0xf5   : > { %v334_v13 = vadd.f32 %v333_v12, %v261_v11  ;;  %v335_v14 = vpop.f32.mrb[1].mxu0 }
  0xf6   : > { %v336_v15 = vadd.f32 %v335_v14, %v261_v11 }
  0xf7   : > { %v338_v16 = vmax.f32 %v334_v13, 0.0 }
  0xf8   : > { %v339_v19 = vmax.f32 %v336_v15, 0.0 }
  0xf9   : > { %v346_v20 = vmul.f32 %v344_v18, %v338_v16 }
  0xfa   : > { %v347_v21 = vmul.f32 %v344_v18, %v339_v19 }
  0xfb   : > { %v348_v22 = vrot.slane %v346_v20, 4 }
  0xfc   : > { %v354_v24 = vrot.slane %v347_v21, 4 }
  0xfd   : > { %v349_v25 = vadd.f32 %v348_v22, %v346_v20 }
  0xfe   : > { %v355_v26 = vadd.f32 %v354_v24, %v347_v21 }
  0xff   : > { %v350_v27 = vrot.slane %v349_v25, 2 }
 0x100   : > { %v356_v29 = vrot.slane %v355_v26, 2 }
 0x101   : > { %v351_v31 = vadd.f32 %v350_v27, %v349_v25 }
 0x102   : > { %v357_v34 = vadd.f32 %v356_v29, %v355_v26 }
 0x103   : > { %v352_v35 = vrot.slane %v351_v31, 1 }
 0x104   : > { %v358_v37 = vrot.slane %v357_v34, 1 }
 0x105   : > { %v353_v38 = vadd.f32 %v352_v35, %v351_v31 }
 0x106   : > { %v359_v40 = vadd.f32 %v358_v37, %v357_v34 }
 0x107   : > { %v370_v41 = vadd.f32 %v369_v36, %v353_v38 }
 0x108   : > { %v371_v42 = vadd.f32 %v369_v36, %v359_v40 }
 0x109   : > { %v372_v43 = vmax.f32 %v370_v41, 0.0 }
 0x10a   : > { %v373_v45 = vmax.f32 %v371_v42, 0.0 }
 0x10c   : > { %v376_v46 = vcombine.low %v372_v43, %v373_v45  ;;  %404 = sbr.rel (!%p674_p5) target bundleno = 302 (0x12e), region = 44 }
 0x10e   : > { %v383_v47 = vrot.slane %v376_v46, %v382_v44 }
 0x110   : > { %v390_v48 = vrot.slane %v383_v47, %v382_v44 }
 0x112   : > { %396 = vst.msk [vmem:[%s232_s24] sm:$0x3] %vm394_vm1, %v390_v48 }
 0x113   : > { %s773_s27 = smov (!%p407_p11, %s406_s27), 2 }
 0x114   : > { %s711_s7 = sshll.u32 %s773_s27, 4 }
 0x115   : > { %s411_s8 = ssub.s32 32, %s711_s7 }
 0x116   : > { %412 = vsyncadd %s706_s26, %s411_s8  ;;  %p487_p12 = scmp.ne.s32.totalorder %s711_s7, 0  ;;  %s491_s9 = sshll.u32 %s657_s3, 5 }
 0x117   : > { %s720_s29 = scalar_lea.hbm %s765_s5, %s491_s9  ;;  %s417_s12 = sshll.u32 %s232_s24, 4  ;;  %s418_s12 = int_to_ptr.vmem [resolvable:$true] %s417_s12 }
 0x118   : > { %s535_s6 = scalar_lea.vmem %s418_s12, %s711_s7  ;;  %s602_s13 = smov [#allocation3]  }
 0x119   : > { %p536_p13 = scmp.ne.s32.totalorder %s418_s12, %s535_s6  ;;  %s539_s14 = sshll.u32 %s602_s13, 4  ;;  %s540_s14 = int_to_ptr.vmem [resolvable:$false] %s539_s14 }
 0x11a   : > { %s541_s15 = scalar_lea.vmem %s540_s14, 64  ;;  %p542_p2 = scmp.lt.s32.totalorder %s418_s12, %s540_s14 }
 0x11b   : > { %p537_p0 = pnand %p536_p13, %p487_p12  ;;  %p543_p3 = scmp.lt.s32.totalorder %s541_s15, %s535_s6 }
 0x11d   : > { %p538_p1 = pneg %p537_p0  ;;  %p544_p4 = por %p543_p3, %p542_p2 }
 0x11f   : > { %p545_p5 = pnand %p544_p4, %p538_p1 }
 0x121   : > { %548 = shalt.err (!%p545_p5)
}
 0x122   : > { %s549_s3 = scalar_lea.hbm %s720_s29, %s711_s7  ;;  %s553_s18 = scalar_lea.hbm %s765_s5, 48 }
 0x123   : > { %p550_p7 = scmp.ne.s32.totalorder %s720_s29, %s549_s3  ;;  %p554_p10 = scmp.lt.u32.totalorder %s720_s29, %s765_s5 }
 0x124   : > { %p555_p11 = scmp.lt.u32.totalorder %s553_s18, %s549_s3  ;;  %p557_p0 = scmp.lt.u32.totalorder %s549_s3, %s720_s29 }
 0x125   : > { %p551_p8 = pnand %p550_p7, %p487_p12 }
 0x126   : > { %p556_p13 = por %p555_p11, %p554_p10 }
 0x127   : > { %p552_p9 = pneg %p551_p8 }
 0x128   : > { %p558_p1 = por %p557_p0, %p556_p13 }
 0x12a   : > { %p559_p2 = pnand %p558_p1, %p552_p9 }
 0x12c   : > { %562 = shalt.err (!%p559_p2)
}
 0x12d   : > { %420 = dma.vmem_to_hbm [thread:$0]  (%p487_p12), %s418_s12, %s711_s7, %s720_s29, %s706_s26  }
 0x12e PF: > { %p497_p3 = scmp.ge.s32.totalorder %s597_s23, 2  ;;  %s429_s27 = sand.u32 1, %s585_s20  }
 0x12f   : > { %s430_s8 = scalar_lea.sflag [#allocation4], %s429_s27 }
 0x130   : > { %p494_p4 = pnand %p497_p3, %p678_p6 }
 0x132   : > { %580 = dma.done.wait (!%p494_p4), %s430_s8, 32  }
 0x133   : > { %582 = vsyncadd (!%p494_p4), %s430_s8, 4294967264  ;;  %p17_p5 = scmp.ge.s32.totalorder %s661_s25, 4   ;;  %s768_s20 = smov %s589_s21 }
 0x134   : > { %s769_s21 = smov %s593_s22  ;;  %s770_s22 = smov %s672_s28 }
 0x135   : > { %s771_s23 = smov %s661_s25  ;;  %19 = sbr.rel (!%p17_p5) target bundleno = 6 (0x6), region = 75 }
 0x13c   :  { %435 = vsyncpa [#allocation4], 1 }
 0x13d   :  { %437 = vsyncpa [#allocation4 + $0x1], 1 }

</bundles_post_ra>
